<compile_context>
chip_gen: v7x
topology: tpu7x:2x2x1
jax: 0.10.0
libtpu: 0.0.40
codegen_flags: <defaults>
</compile_context>

<pallas_src>
import functools
import math

import jax
import jax.numpy as jnp
from jax.experimental import pallas as pl
from jax.experimental.pallas import tpu as pltpu


def _build_pe_table(d_model: int, max_seq_len: int) -> jnp.ndarray:
    """Reproduce the PyTorch init loop exactly, vectorized.

    For every column j the exponent is 2*j/d_model; even columns take sin,
    odd columns take cos (matches the TFT reference, not the canonical
    transformer PE).
    """
    pos = jnp.arange(max_seq_len, dtype=jnp.float32)[:, None]      # (L, 1)
    j = jnp.arange(d_model, dtype=jnp.float32)[None, :]            # (1, D)
    denom = jnp.power(10000.0, 2.0 * j / float(d_model))           # (1, D)
    arg = pos / denom                                              # (L, D)
    even = (jnp.arange(d_model) % 2 == 0)[None, :]                 # (1, D)
    return jnp.where(even, jnp.sin(arg), jnp.cos(arg)).astype(jnp.float32)


def _pos_enc_kernel(x_ref, pe_ref, o_ref, *, scale):
    # x_ref / o_ref : (ts, B, D) full-width block of x / out.
    # pe_ref        : (ts, 1, D) f32 block; broadcast over the batch dim.
    x = x_ref[...].astype(jnp.float32)
    o_ref[...] = (x * scale + pe_ref[...]).astype(o_ref.dtype)


def _round_up(v: int, m: int) -> int:
    return ((v + m - 1) // m) * m


def _vmem_budget_for_device():
    """Return (tile budget bytes, vmem_limit_bytes or None, min seq tiles)."""
    try:
        kind = jax.devices()[0].device_kind.lower()
    except Exception:  # pragma: no cover - defensive; fall back to safe default
        kind = ""
    if "v7" in kind or "7x" in kind:
        # 64 MiB physical VMEM per TC, 3.2 TB/s HBM, 2 TensorCores share grid.
        return 24 * 1024 * 1024, 40 * 1024 * 1024, 4
    if "v6" in kind:
        # 128 MiB physical VMEM, 32 MiB scoped default, ~1.4 TB/s HBM.
        return 40 * 1024 * 1024, 64 * 1024 * 1024, 2
    if "v5p" in kind or "v4" in kind:
        return 24 * 1024 * 1024, 48 * 1024 * 1024, 2
    # v5e / unknown: stay under the 16 MiB scoped default, no override.
    return 12 * 1024 * 1024, None, 2


def _choose_seq_tile(seq_len, batch, d_model, dtype, budget, min_tiles):
    """Largest dtype-aligned seq tile whose double-buffered blocks fit budget."""
    itemsize = jnp.dtype(dtype).itemsize
    row_align = 8 * max(1, 4 // itemsize)       # 8 f32, 16 bf16, 32 int8/fp8
    pad_b = _round_up(batch, row_align)         # sublane padding of the B dim
    pad_d = _round_up(d_model, 128)             # lane padding of the D dim
    # Real padded VMEM footprint per sequence row, double-buffered:
    #   x + out blocks in x.dtype, plus the f32 PE block (its size-1 middle
    #   dim pads to 8 sublanes).
    per_row = 2 * 2 * itemsize * pad_b * pad_d + 2 * 4 * 8 * pad_d
    max_ts = max(row_align, ((budget // per_row) // row_align) * row_align)

    ts = min(seq_len, max_ts)

    # For non-trivial sizes keep >= min_tiles grid steps so input/output DMA
    # overlap and (on v7x) each TensorCore gets >= 2 steps of its own.
    total_bytes = seq_len * batch * d_model * itemsize
    if total_bytes > (2 << 20) and pl.cdiv(seq_len, ts) < min_tiles:
        ts = ((seq_len // min_tiles) // row_align) * row_align

    ts = max(row_align, ts)
    return max(1, min(ts, seq_len))


def positional_encoder(x: jnp.ndarray,
                       pe_table: jnp.ndarray,
                       *,
                       vmem_budget_bytes: int | None = None,
                       vmem_limit_bytes: int | None = None,
                       min_seq_tiles: int | None = None) -> jnp.ndarray:
    """x: (seq_len, batch, d_model); pe_table: (max_seq_len, d_model) float32."""
    seq_len, batch, d_model = x.shape
    scale = math.sqrt(d_model)

    if vmem_budget_bytes is None:
        auto_budget, auto_limit, auto_min = _vmem_budget_for_device()
        vmem_budget_bytes = auto_budget
        if vmem_limit_bytes is None:
            vmem_limit_bytes = auto_limit
        if min_seq_tiles is None:
            min_seq_tiles = auto_min
    if min_seq_tiles is None:
        min_seq_tiles = 2

    ts = _choose_seq_tile(seq_len, batch, d_model, x.dtype,
                          vmem_budget_bytes, min_seq_tiles)

    # Tiny (S, 1, D) f32 addend; read from HBM exactly once per call.
    pe = pe_table[:seq_len].astype(jnp.float32).reshape(seq_len, 1, d_model)

    grid = (pl.cdiv(seq_len, ts),)
    kernel = functools.partial(_pos_enc_kernel, scale=scale)

    cp_kwargs = dict(dimension_semantics=("parallel",))
    if vmem_limit_bytes is not None:
        cp_kwargs["vmem_limit_bytes"] = int(vmem_limit_bytes)

    return pl.pallas_call(
        kernel,
        out_shape=jax.ShapeDtypeStruct((seq_len, batch, d_model), x.dtype),
        grid=grid,
        in_specs=[
            pl.BlockSpec((ts, batch, d_model), lambda s: (s, 0, 0)),
            pl.BlockSpec((ts, 1, d_model), lambda s: (s, 0, 0)),
        ],
        out_specs=pl.BlockSpec((ts, batch, d_model), lambda s: (s, 0, 0)),
        compiler_params=pltpu.CompilerParams(**cp_kwargs),
    )(x, pe)


def positional_encoder_ref(x: jnp.ndarray, pe_table: jnp.ndarray) -> jnp.ndarray:
    seq_len, _, d_model = x.shape
    pe = pe_table[:seq_len].reshape(seq_len, 1, d_model)
    return (x.astype(jnp.float32) * math.sqrt(d_model) + pe).astype(x.dtype)


if __name__ == "__main__":
    d_model = 32
    max_seq_len = 160

    pe_table = _build_pe_table(d_model, max_seq_len)
    key = jax.random.PRNGKey(0)
    k1, k2, k3 = jax.random.split(key, 3)

    # Case 1: module-sized demo (single full-width tile, grid=(1,)).
    x1 = jax.random.normal(k1, (8, 2, d_model), dtype=jnp.float32)
    out1 = jax.block_until_ready(positional_encoder(x1, pe_table))
    ref1 = positional_encoder_ref(x1, pe_table)
    assert out1.shape == x1.shape
    assert jnp.allclose(out1, ref1, atol=1e-5, rtol=1e-5)

    # Case 2: ragged seq tiles + non-multiple-of-8 batch (tiny budget forces
    # ts=8 -> grid=(5,) with a boundary block on the seq axis).
    x2 = jax.random.normal(k2, (37, 3, d_model), dtype=jnp.float32)
    out2 = jax.block_until_ready(
        positional_encoder(x2, pe_table, vmem_budget_bytes=16 * 1024))
    ref2 = positional_encoder_ref(x2, pe_table)
    assert jnp.allclose(out2, ref2, atol=1e-5, rtol=1e-5)

    # Case 3: bf16 activations (compute in f32, cast on store).
    x3 = jax.random.normal(k3, (16, 4, d_model),
                           dtype=jnp.float32).astype(jnp.bfloat16)
    out3 = jax.block_until_ready(positional_encoder(x3, pe_table))
    ref3 = positional_encoder_ref(x3, pe_table)
    assert jnp.allclose(out3.astype(jnp.float32), ref3.astype(jnp.float32),
                        atol=2e-2, rtol=2e-2)

    print("KERNEL_OK")
</pallas_src>

<mosaic_0001>
module attributes {stable_mosaic.version = 11 : i64} {
  func.func @_pos_enc_kernel(%arg0: i32, %arg1: memref<8x2x32xf32, #tpu.memory_space<vmem>>, %arg2: memref<8x1x32xf32, #tpu.memory_space<vmem>>, %arg3: memref<8x2x32xf32, #tpu.memory_space<vmem>>) attributes {dimension_semantics = [#tpu.dimension_semantics<parallel>], iteration_bounds = array<i64: 1>, scalar_prefetch = 0 : i64, scratch_operands = 0 : i64, tpu.core_type = #tpu.core_type<tc>, window_params = [{transform_indices = @transform_0, window_bounds = array<i64: 8, 2, 32>}, {transform_indices = @transform_1, window_bounds = array<i64: 8, 1, 32>}, {transform_indices = @transform_2, window_bounds = array<i64: 8, 2, 32>}]} {
    %c0 = arith.constant 0 : index
    %c0_0 = arith.constant 0 : index
    %c0_1 = arith.constant 0 : index
    %0 = vector.load %arg1[%c0, %c0_0, %c0_1] : memref<8x2x32xf32, #tpu.memory_space<vmem>>, vector<8x2x32xf32>
    %cst = arith.constant 5.65685415 : f32
    %1 = vector.broadcast %cst : f32 to vector<8x2x32xf32>
    %2 = arith.mulf %0, %1 : vector<8x2x32xf32>
    %c0_2 = arith.constant 0 : index
    %c0_3 = arith.constant 0 : index
    %c0_4 = arith.constant 0 : index
    %3 = vector.load %arg2[%c0_2, %c0_3, %c0_4] : memref<8x1x32xf32, #tpu.memory_space<vmem>>, vector<8x1x32xf32>
    %4 = vector.broadcast %3 : vector<8x1x32xf32> to vector<8x2x32xf32>
    %5 = arith.addf %2, %4 : vector<8x2x32xf32>
    %c0_5 = arith.constant 0 : index
    %c0_6 = arith.constant 0 : index
    %c0_7 = arith.constant 0 : index
    %6 = vector.load %arg3[%c0_5, %c0_6, %c0_7] : memref<8x2x32xf32, #tpu.memory_space<vmem>>, vector<8x2x32xf32>
    tpu.vector_store %arg3[%c0_5, %c0_6, %c0_7], %5 {strides = array<i32>} : memref<8x2x32xf32, #tpu.memory_space<vmem>>, vector<8x2x32xf32>,
    return
  }
  func.func @transform_0(%arg0: i32) -> (i32, i32, i32) {
    %c0_i32 = arith.constant 0 : i32
    %c0_i32_0 = arith.constant 0 : i32
    %c0_i32_1 = arith.constant 0 : i32
    return %arg0, %c0_i32, %c0_i32_0 : i32, i32, i32
  }
  func.func @transform_1(%arg0: i32) -> (i32, i32, i32) {
    %c0_i32 = arith.constant 0 : i32
    %c0_i32_0 = arith.constant 0 : i32
    %c0_i32_1 = arith.constant 0 : i32
    return %arg0, %c0_i32, %c0_i32_0 : i32, i32, i32
  }
  func.func @transform_2(%arg0: i32) -> (i32, i32, i32) {
    %c0_i32 = arith.constant 0 : i32
    %c0_i32_0 = arith.constant 0 : i32
    %c0_i32_1 = arith.constant 0 : i32
    return %arg0, %c0_i32, %c0_i32_0 : i32, i32, i32
  }
}

</mosaic_0001>

<bundles_post_ra>
// kernel: tpu_custom_call.1
= control target key start
LH: loop header
LB: loop body
LE: loop exit
PB: predicated region body
PF: predicated region fallthrough
CT: control target
= control target key end

     0   :  { %7 = vsyncpa [#allocation3], 0  ;;  %s309_s0 = inlined_call_operand.hbm [shape: f32[8,2,32], index: 0, kind: input, shape index: {}]   ;;  %s310_s1 = inlined_call_operand.hbm [shape: f32[8,1,32], index: 1, kind: input, shape index: {}]   ;;  %s311_s2 = inlined_call_operand.hbm [shape: f32[8,2,32], index: 2, kind: output, shape index: {}]  }
   0x1   :  { %8 = vsyncpa [#allocation6], 0 }
   0x2   :  { %9 = vsyncpa [#allocation4], 0  ;;  %s234_s9 = smov [#allocation2]   ;;  %s162_s13 = scalar_lea.hbm %s309_s0, 256 }
   0x3   :  { %s15_s10 = sshll.u32 %s234_s9, 4  ;;  %p163_p0 = scmp.ne.s32.totalorder %s309_s0, %s162_s13  ;;  %s16_s10 = int_to_ptr.vmem [resolvable:$true] %s15_s10 }
   0x4   :  { %p166_p1 = scmp.lt.u32.totalorder %s162_s13, %s309_s0 }
   0x6   :  { %p168_p2 = pnand %p166_p1, %p163_p0 }
   0x8   :  { %171 = shalt.err (!%p168_p2)
}
   0x9   :  { %s172_s18 = scalar_lea.vmem %s16_s10, 256  ;;  %p177_p4 = scmp.lt.s32.totalorder %s16_s10, %s16_s10 }
   0xa   :  { %p173_p3 = scmp.ne.s32.totalorder %s16_s10, %s172_s18  ;;  %p178_p5 = scmp.lt.s32.totalorder %s172_s18, %s172_s18 }
   0xc   :  { %p179_p6 = por %p178_p5, %p177_p4 }
   0xe   :  { %p180_p7 = pnand %p179_p6, %p173_p3 }
  0x10   :  { %183 = shalt.err (!%p180_p7)
}
  0x11   :  { %s235_s19 = smov 32   ;;  %s236_s20 = smov 2  }
  0x12   :  { %21 = dma.hbm_to_vmem [thread:$0]  %s309_s0, 256, %s16_s10, [#allocation3], %s235_s19, %s235_s19, %s236_s20  }
  0x13   :  { %s237_s23 = smov [#allocation5]   ;;  %s184_s27 = scalar_lea.hbm %s310_s1, 128 }
  0x14   :  { %s27_s24 = sshll.u32 %s237_s23, 4  ;;  %p185_p8 = scmp.ne.s32.totalorder %s310_s1, %s184_s27  ;;  %s28_s24 = int_to_ptr.vmem [resolvable:$true] %s27_s24 }
  0x15   :  { %p188_p9 = scmp.lt.u32.totalorder %s184_s27, %s310_s1 }
  0x17   :  { %p190_p10 = pnand %p188_p9, %p185_p8 }
  0x19   :  { %193 = shalt.err (!%p190_p10)
}
  0x1a   :  { %s194_s4 = scalar_lea.vmem %s28_s24, 128  ;;  %p199_p12 = scmp.lt.s32.totalorder %s28_s24, %s28_s24 }
  0x1b   :  { %p195_p11 = scmp.ne.s32.totalorder %s28_s24, %s194_s4  ;;  %p200_p13 = scmp.lt.s32.totalorder %s194_s4, %s194_s4 }
  0x1d   :  { %p201_p0 = por %p200_p13, %p199_p12 }
  0x1f   :  { %p202_p1 = pnand %p201_p0, %p195_p11 }
  0x21   :  { %205 = shalt.err (!%p202_p1)
}
  0x22   :  { %s238_s0 = smov 16   ;;  %s239_s5 = smov 1  }
  0x23   :  { %33 = dma.hbm_to_vmem [thread:$0]  %s310_s1, 128, %s28_s24, [#allocation6], %s238_s0, %s238_s0, %s239_s5  }
  0x24   :  { %228 = dma.done.wait [#allocation3], 256  }
  0x25   :  { %229 = vsyncadd [#allocation3], 4294967040 }
  0x26   :  { %230 = dma.done.wait [#allocation6], 128  }
  0x27   :  { %231 = vsyncadd [#allocation6], 4294967168  ;;  %vm120_vm0 = vcmask 254976   ;;  %s240_s8 = smov [#allocation7]   ;;  %v40_v0 = vld [vmem:[#allocation2] sm:$0x3] }
  0x28   :  { %s283_s9 = sshll.u32 %s240_s8, 4  ;;  %v147_v1 = vld [vmem:[#allocation5] ss:$0 sm:$0xff]  ;;  %v41_v2 = vld [vmem:[#allocation2 + $0x2] sm:$0x3]  ;;  %s135_s9 = int_to_ptr.vmem [resolvable:$true] %s283_s9 }
  0x29   :  { %v48_v3 = vmul.f32 5.656854, %v40_v0  ;;  %v49_v4 = vmul.f32 5.656854, %v41_v2  ;;  %v148_v5 = vld [vmem:[#allocation5 + $0x1] ss:$0 sm:$0xff]  ;;  %p211_p3 = scmp.lt.s32.totalorder %s135_s9, %s135_s9 }
  0x2a   :  { %v42_v6 = vld [vmem:[#allocation2 + $0x4] sm:$0x3]  ;;  %v149_v7 = vld [vmem:[#allocation5 + $0x2] ss:$0 sm:$0xff]  ;;  %v43_v8 = vld [vmem:[#allocation2 + $0x6] sm:$0x3] }
  0x2b   :  { %v112_v9 = vadd.f32 %v147_v1, %v48_v3  ;;  %v113_v10 = vadd.f32 %v148_v5, %v49_v4  ;;  %v50_v11 = vmul.f32 5.656854, %v42_v6  ;;  %v51_v12 = vmul.f32 5.656854, %v43_v8  ;;  %v150_v13 = vld [vmem:[#allocation5 + $0x3] ss:$0 sm:$0xff] }
  0x2c   :  { %v44_v14 = vld [vmem:[#allocation2 + $0x8] sm:$0x3]  ;;  %v151_v15 = vld [vmem:[#allocation5 + $0x4] ss:$0 sm:$0xff]  ;;  %v45_v16 = vld [vmem:[#allocation2 + $0xa] sm:$0x3] }
  0x2d   :  { %121 = vst.msk [vmem:[#allocation7] sm:$0x3] %vm120_vm0, %v112_v9  ;;  %122 = vst.msk [vmem:[#allocation7 + $0x2] sm:$0x3] %vm120_vm0, %v113_v10  ;;  %v114_v17 = vadd.f32 %v149_v7, %v50_v11  ;;  %v115_v18 = vadd.f32 %v150_v13, %v51_v12  ;;  %v52_v19 = vmul.f32 5.656854, %v44_v14 }
  0x2e   :  { %v53_v20 = vmul.f32 5.656854, %v45_v16  ;;  %v152_v21 = vld [vmem:[#allocation5 + $0x5] ss:$0 sm:$0xff]  ;;  %v46_v22 = vld [vmem:[#allocation2 + $0xc] sm:$0x3] }
  0x2f   :  { %v153_v23 = vld [vmem:[#allocation5 + $0x6] ss:$0 sm:$0xff]  ;;  %v47_v24 = vld [vmem:[#allocation2 + $0xe] sm:$0x3]  ;;  %123 = vst.msk [vmem:[#allocation7 + $0x4] sm:$0x3] %vm120_vm0, %v114_v17  ;;  %v116_v25 = vadd.f32 %v151_v15, %v52_v19 }
  0x30   :  { %124 = vst.msk [vmem:[#allocation7 + $0x6] sm:$0x3] %vm120_vm0, %v115_v18  ;;  %v117_v26 = vadd.f32 %v152_v21, %v53_v20  ;;  %v54_v27 = vmul.f32 5.656854, %v46_v22  ;;  %v55_v28 = vmul.f32 5.656854, %v47_v24 }
  0x31   :  { %v154_v29 = vld [vmem:[#allocation5 + $0x7] ss:$0 sm:$0xff]  ;;  %125 = vst.msk [vmem:[#allocation7 + $0x8] sm:$0x3] %vm120_vm0, %v116_v25  ;;  %s206_s1 = scalar_lea.vmem %s135_s9, 256 }
  0x32   :  { %126 = vst.msk [vmem:[#allocation7 + $0xa] sm:$0x3] %vm120_vm0, %v117_v26  ;;  %v118_v30 = vadd.f32 %v153_v23, %v54_v27  ;;  %v119_v31 = vadd.f32 %v154_v29, %v55_v28  ;;  %p207_p2 = scmp.ne.s32.totalorder %s135_s9, %s206_s1  ;;  %p212_p4 = scmp.lt.s32.totalorder %s206_s1, %s206_s1 }
  0x34   :  { %127 = vst.msk [vmem:[#allocation7 + $0xc] sm:$0x3] %vm120_vm0, %v118_v30  ;;  %128 = vst.msk [vmem:[#allocation7 + $0xe] sm:$0x3] %vm120_vm0, %v119_v31  ;;  %p213_p5 = por %p212_p4, %p211_p3 }
  0x36   :  { %p214_p6 = pnand %p213_p5, %p207_p2 }
  0x38   :  { %217 = shalt.err (!%p214_p6)
}
  0x39   :  { %s218_s12 = scalar_lea.hbm %s311_s2, 256 }
  0x3a   :  { %p219_p7 = scmp.ne.s32.totalorder %s311_s2, %s218_s12  ;;  %p222_p8 = scmp.lt.u32.totalorder %s218_s12, %s311_s2 }
  0x3c   :  { %p224_p9 = pnand %p222_p8, %p219_p7 }
  0x3e   :  { %227 = shalt.err (!%p224_p9)
}
  0x3f   :  { %140 = dma.vmem_to_hbm [thread:$0]  %s135_s9, 256, %s311_s2, [#allocation4], %s235_s19, %s235_s19, %s236_s20  }
  0x40   :  { %232 = dma.done.wait [#allocation4], 256  }
  0x41   :  { %233 = vsyncadd [#allocation4], 4294967040 }
  0x42   :  { %144 = vsyncpa [#allocation3], 1 }
  0x43   :  { %145 = vsyncpa [#allocation6], 1 }
  0x44   :  { %146 = vsyncpa [#allocation4], 1 }

</bundles_post_ra>
